<compile_context>
chip_gen: v5e
topology: v5e:2x2
jax: 0.10.0
libtpu: 0.0.40
codegen_flags: <defaults>
</compile_context>

<pallas_src>
import functools

import jax
import jax.numpy as jnp
from jax.experimental import pallas as pl
from jax.experimental.pallas import tpu as pltpu


def _round_up(x, m):
    return ((x + m - 1) // m) * m


# --------------------------------------------------------------------------
# Kernel: fused 3-layer MLP over one batch tile.
# --------------------------------------------------------------------------
def qtran_mixer_kernel(x_ref, w1_ref, b1_ref, w2_ref, b2_ref, w3_ref, b3_ref,
                       out_ref):
    x = x_ref[...]                                                 # [TB, K]
    h = jnp.dot(x, w1_ref[...], preferred_element_type=jnp.float32)
    h = jnp.maximum(h + b1_ref[...], 0.0)                          # [TB, 2E]
    h = jnp.dot(h, w2_ref[...], preferred_element_type=jnp.float32)
    h = jnp.maximum(h + b2_ref[...], 0.0)                          # [TB, 2E]
    out = jnp.dot(h, w3_ref[...], preferred_element_type=jnp.float32)
    out_ref[...] = (out + b3_ref[...]).astype(out_ref.dtype)       # [TB, 2]


# --------------------------------------------------------------------------
# Wrapper
# --------------------------------------------------------------------------
def qtran_mixer_forward(states, agent_qs, packed_params, n_agents,
                        tb_max=1024):
    """states: [bs, state_dim] (or [bs, x, y]); agent_qs: reshapeable to
    [bs, n_agents].  Returns (q, v), each [bs, 1]."""
    bs = states.shape[0]
    if states.ndim == 3:
        states = states.reshape(bs, -1)               # glue: .view(bs, -1)
    agent_qs = agent_qs.reshape(bs, n_agents)         # glue: .view(bs, n_agents)

    # One cheap XLA concat in the wrapper; single first-layer weight inside.
    x = jnp.concatenate([states, agent_qs], axis=1).astype(jnp.float32)
    K = x.shape[1]

    w1, b1, w2, b2, w3, b3 = packed_params
    E2 = w1.shape[1]                                  # 2 * embed_dim

    # Batch tile: multiple of 8 sublanes, grid streams over batch, pad if
    # needed.  Biggest tile that fits VMEM easily (weights are tiny).
    tb = min(tb_max, _round_up(bs, 8))
    bs_pad = _round_up(bs, tb)
    if bs_pad != bs:
        x = jnp.pad(x, ((0, bs_pad - bs), (0, 0)))
    num_blocks = bs_pad // tb

    cost = pl.CostEstimate(
        flops=2 * bs_pad * (K * E2 + E2 * E2 + E2 * 2),
        transcendentals=0,
        bytes_accessed=4 * (bs_pad * K + bs_pad * 2
                            + K * E2 + E2 + E2 * E2 + E2 + E2 * 2 + 2),
    )

    const_map = lambda i: (0, 0)                      # weights stay VMEM-resident
    out = pl.pallas_call(
        qtran_mixer_kernel,
        out_shape=jax.ShapeDtypeStruct((bs_pad, 2), jnp.float32),
        grid=(num_blocks,),
        in_specs=[
            pl.BlockSpec((tb, K), lambda i: (i, 0)),  # x tile streams over batch
            pl.BlockSpec((K, E2), const_map),         # W1
            pl.BlockSpec((1, E2), const_map),         # b1
            pl.BlockSpec((E2, E2), const_map),        # W2
            pl.BlockSpec((1, E2), const_map),         # b2
            pl.BlockSpec((E2, 2), const_map),         # W3
            pl.BlockSpec((1, 2), const_map),          # b3
        ],
        out_specs=pl.BlockSpec((tb, 2), lambda i: (i, 0)),
        compiler_params=pltpu.CompilerParams(
            dimension_semantics=("parallel",),        # v7x: shard batch over 2 TCs
        ),
        cost_estimate=cost,
    )(x, w1, b1, w2, b2, w3, b3)

    q = out[:bs, 0:1]
    v = out[:bs, 1:2]
    return q, v


# --------------------------------------------------------------------------
# Parameters: raw (per-module, PyTorch-style [in, out]) and packed (fused
# block-diagonal form consumed by the kernel).
# --------------------------------------------------------------------------
def init_raw_params(key, state_dim, n_agents, embed_dim):
    ks = jax.random.split(key, 12)
    w = lambda k, i, o: jax.random.normal(k, (i, o), jnp.float32) * 0.1
    b = lambda k, o: jax.random.normal(k, (1, o), jnp.float32) * 0.1

    # Q net: Linear(state_dim + n_agents, E), Linear(E, E), Linear(E, 1)
    w1q = w(ks[0], state_dim + n_agents, embed_dim)
    b1q = b(ks[1], embed_dim)
    w2q = w(ks[2], embed_dim, embed_dim)
    b2q = b(ks[3], embed_dim)
    w3q = w(ks[4], embed_dim, 1)
    b3q = b(ks[5], 1)
    # V net: Linear(state_dim, E), Linear(E, E), Linear(E, 1)
    w1v = w(ks[6], state_dim, embed_dim)
    b1v = b(ks[7], embed_dim)
    w2v = w(ks[8], embed_dim, embed_dim)
    b2v = b(ks[9], embed_dim)
    w3v = w(ks[10], embed_dim, 1)
    b3v = b(ks[11], 1)

    return (w1q, b1q, w2q, b2q, w3q, b3q,
            w1v, b1v, w2v, b2v, w3v, b3v)


def pack_params(raw, state_dim, n_agents, embed_dim):
    (w1q, b1q, w2q, b2q, w3q, b3q,
     w1v, b1v, w2v, b2v, w3v, b3v) = raw
    E = embed_dim
    zE = jnp.zeros((E, E), jnp.float32)
    z1 = jnp.zeros((E, 1), jnp.float32)

    # Layer 1: [K, 2E].  Q columns see full concat(states, agent_qs);
    # V columns see only states (agent-q rows zeroed).
    w1v_pad = jnp.concatenate([w1v, jnp.zeros((n_agents, E), jnp.float32)], axis=0)
    W1 = jnp.concatenate([w1q, w1v_pad], axis=1)
    B1 = jnp.concatenate([b1q, b1v], axis=1)

    # Layer 2: block-diagonal [2E, 2E].
    W2 = jnp.block([[w2q, zE], [zE, w2v]])
    B2 = jnp.concatenate([b2q, b2v], axis=1)

    # Layer 3: block-diagonal [2E, 2] -> (q, v) as two lanes.
    W3 = jnp.block([[w3q, z1], [z1, w3v]])
    B3 = jnp.concatenate([b3q, b3v], axis=1)

    return W1, B1, W2, B2, W3, B3


# --------------------------------------------------------------------------
# Pure-JAX reference (unfused, mirrors the PyTorch module exactly).
# --------------------------------------------------------------------------
def reference_forward(states, agent_qs, raw, n_agents):
    (w1q, b1q, w2q, b2q, w3q, b3q,
     w1v, b1v, w2v, b2v, w3v, b3v) = raw
    bs = states.shape[0]
    if states.ndim == 3:
        states = states.reshape(bs, -1)
    a = agent_qs.reshape(bs, n_agents)
    x = jnp.concatenate([states, a], axis=1)
    h = jnp.maximum(x @ w1q + b1q, 0.0)
    h = jnp.maximum(h @ w2q + b2q, 0.0)
    q = h @ w3q + b3q
    hv = jnp.maximum(states @ w1v + b1v, 0.0)
    hv = jnp.maximum(hv @ w2v + b2v, 0.0)
    v = hv @ w3v + b3v
    return q, v


if __name__ == "__main__":
    bs = 8
    state_dim = 16
    n_agents = 4
    embed_dim = 32

    key = jax.random.PRNGKey(0)
    k_params, k_states, k_aq = jax.random.split(key, 3)

    raw = init_raw_params(k_params, state_dim, n_agents, embed_dim)
    packed = pack_params(raw, state_dim, n_agents, embed_dim)

    states = jax.random.normal(k_states, (bs, state_dim), jnp.float32)
    agent_qs = jax.random.normal(k_aq, (bs, n_agents), jnp.float32)

    fwd = functools.partial(qtran_mixer_forward, n_agents=n_agents)
    q, v = fwd(states, agent_qs, packed_params=packed)
    q = jax.block_until_ready(q)
    v = jax.block_until_ready(v)

    q_ref, v_ref = reference_forward(states, agent_qs, raw, n_agents)
    assert q.shape == (bs, 1) and v.shape == (bs, 1)
    assert jnp.allclose(q, q_ref, atol=1e-5, rtol=1e-5)
    assert jnp.allclose(v, v_ref, atol=1e-5, rtol=1e-5)

    print("KERNEL_OK")
</pallas_src>

<mosaic_0001>
module attributes {stable_mosaic.version = 11 : i64} {
  func.func @qtran_mixer_kernel(%arg0: i32, %arg1: memref<8x20xf32, #tpu.memory_space<vmem>>, %arg2: memref<20x64xf32, #tpu.memory_space<vmem>>, %arg3: memref<1x64xf32, #tpu.memory_space<vmem>>, %arg4: memref<64x64xf32, #tpu.memory_space<vmem>>, %arg5: memref<1x64xf32, #tpu.memory_space<vmem>>, %arg6: memref<64x2xf32, #tpu.memory_space<vmem>>, %arg7: memref<1x2xf32, #tpu.memory_space<vmem>>, %arg8: memref<8x2xf32, #tpu.memory_space<vmem>>) attributes {dimension_semantics = [#tpu.dimension_semantics<parallel>], iteration_bounds = array<i64: 1>, scalar_prefetch = 0 : i64, scratch_operands = 0 : i64, tpu.core_type = #tpu.core_type<tc>, window_params = [{transform_indices = @transform_0, window_bounds = array<i64: 8, 20>}, {pipeline_mode = #tpu.pipeline_mode<synchronous>, transform_indices = @transform_1, window_bounds = array<i64: 20, 64>}, {pipeline_mode = #tpu.pipeline_mode<synchronous>, transform_indices = @transform_2, window_bounds = array<i64: 1, 64>}, {pipeline_mode = #tpu.pipeline_mode<synchronous>, transform_indices = @transform_3, window_bounds = array<i64: 64, 64>}, {pipeline_mode = #tpu.pipeline_mode<synchronous>, transform_indices = @transform_4, window_bounds = array<i64: 1, 64>}, {pipeline_mode = #tpu.pipeline_mode<synchronous>, transform_indices = @transform_5, window_bounds = array<i64: 64, 2>}, {pipeline_mode = #tpu.pipeline_mode<synchronous>, transform_indices = @transform_6, window_bounds = array<i64: 1, 2>}, {transform_indices = @transform_7, window_bounds = array<i64: 8, 2>}]} {
    %c0 = arith.constant 0 : index
    %c0_0 = arith.constant 0 : index
    %0 = vector.load %arg1[%c0, %c0_0] : memref<8x20xf32, #tpu.memory_space<vmem>>, vector<8x20xf32>
    %c0_1 = arith.constant 0 : index
    %c0_2 = arith.constant 0 : index
    %1 = vector.load %arg2[%c0_1, %c0_2] : memref<20x64xf32, #tpu.memory_space<vmem>>, vector<20x64xf32>
    %cst = arith.constant dense<0.000000e+00> : vector<8x64xf32>
    %2 = tpu.matmul %0, %1, %cst {dimension_numbers = #tpu.dot_dimension_numbers<[1], [0], [0], [1], [0, 0, 1, 1], [], []>} : vector<8x20xf32>, vector<20x64xf32>, vector<8x64xf32> -> vector<8x64xf32>
    %c0_3 = arith.constant 0 : index
    %c0_4 = arith.constant 0 : index
    %3 = vector.load %arg3[%c0_3, %c0_4] : memref<1x64xf32, #tpu.memory_space<vmem>>, vector<1x64xf32>
    %4 = vector.broadcast %3 : vector<1x64xf32> to vector<8x64xf32>
    %5 = arith.addf %2, %4 : vector<8x64xf32>
    %cst_5 = arith.constant 0.000000e+00 : f32
    %6 = vector.broadcast %cst_5 : f32 to vector<8x64xf32>
    %7 = arith.maximumf %5, %6 : vector<8x64xf32>
    %c0_6 = arith.constant 0 : index
    %c0_7 = arith.constant 0 : index
    %8 = vector.load %arg4[%c0_6, %c0_7] : memref<64x64xf32, #tpu.memory_space<vmem>>, vector<64x64xf32>
    %cst_8 = arith.constant dense<0.000000e+00> : vector<8x64xf32>
    %9 = tpu.matmul %7, %8, %cst_8 {dimension_numbers = #tpu.dot_dimension_numbers<[1], [0], [0], [1], [0, 0, 1, 1], [], []>} : vector<8x64xf32>, vector<64x64xf32>, vector<8x64xf32> -> vector<8x64xf32>
    %c0_9 = arith.constant 0 : index
    %c0_10 = arith.constant 0 : index
    %10 = vector.load %arg5[%c0_9, %c0_10] : memref<1x64xf32, #tpu.memory_space<vmem>>, vector<1x64xf32>
    %11 = vector.broadcast %10 : vector<1x64xf32> to vector<8x64xf32>
    %12 = arith.addf %9, %11 : vector<8x64xf32>
    %cst_11 = arith.constant 0.000000e+00 : f32
    %13 = vector.broadcast %cst_11 : f32 to vector<8x64xf32>
    %14 = arith.maximumf %12, %13 : vector<8x64xf32>
    %c0_12 = arith.constant 0 : index
    %c0_13 = arith.constant 0 : index
    %15 = vector.load %arg6[%c0_12, %c0_13] : memref<64x2xf32, #tpu.memory_space<vmem>>, vector<64x2xf32>
    %cst_14 = arith.constant dense<0.000000e+00> : vector<8x2xf32>
    %16 = tpu.matmul %14, %15, %cst_14 {dimension_numbers = #tpu.dot_dimension_numbers<[1], [0], [0], [1], [0, 0, 1, 1], [], []>} : vector<8x64xf32>, vector<64x2xf32>, vector<8x2xf32> -> vector<8x2xf32>
    %c0_15 = arith.constant 0 : index
    %c0_16 = arith.constant 0 : index
    %17 = vector.load %arg7[%c0_15, %c0_16] : memref<1x2xf32, #tpu.memory_space<vmem>>, vector<1x2xf32>
    %18 = vector.broadcast %17 : vector<1x2xf32> to vector<8x2xf32>
    %19 = arith.addf %16, %18 : vector<8x2xf32>
    %c0_17 = arith.constant 0 : index
    %c0_18 = arith.constant 0 : index
    %20 = vector.load %arg8[%c0_17, %c0_18] : memref<8x2xf32, #tpu.memory_space<vmem>>, vector<8x2xf32>
    tpu.vector_store %arg8[%c0_17, %c0_18], %19 {strides = array<i32>} : memref<8x2xf32, #tpu.memory_space<vmem>>, vector<8x2xf32>,
    return
  }
  func.func @transform_0(%arg0: i32) -> (i32, i32) {
    %c0_i32 = arith.constant 0 : i32
    %c0_i32_0 = arith.constant 0 : i32
    return %arg0, %c0_i32 : i32, i32
  }
  func.func @transform_1(%arg0: i32) -> (i32, i32) {
    %c0_i32 = arith.constant 0 : i32
    %c0_i32_0 = arith.constant 0 : i32
    %c0_i32_1 = arith.constant 0 : i32
    return %c0_i32, %c0_i32_0 : i32, i32
  }
  func.func @transform_2(%arg0: i32) -> (i32, i32) {
    %c0_i32 = arith.constant 0 : i32
    %c0_i32_0 = arith.constant 0 : i32
    %c0_i32_1 = arith.constant 0 : i32
    return %c0_i32, %c0_i32_0 : i32, i32
  }
  func.func @transform_3(%arg0: i32) -> (i32, i32) {
    %c0_i32 = arith.constant 0 : i32
    %c0_i32_0 = arith.constant 0 : i32
    %c0_i32_1 = arith.constant 0 : i32
    return %c0_i32, %c0_i32_0 : i32, i32
  }
  func.func @transform_4(%arg0: i32) -> (i32, i32) {
    %c0_i32 = arith.constant 0 : i32
    %c0_i32_0 = arith.constant 0 : i32
    %c0_i32_1 = arith.constant 0 : i32
    return %c0_i32, %c0_i32_0 : i32, i32
  }
  func.func @transform_5(%arg0: i32) -> (i32, i32) {
    %c0_i32 = arith.constant 0 : i32
    %c0_i32_0 = arith.constant 0 : i32
    %c0_i32_1 = arith.constant 0 : i32
    return %c0_i32, %c0_i32_0 : i32, i32
  }
  func.func @transform_6(%arg0: i32) -> (i32, i32) {
    %c0_i32 = arith.constant 0 : i32
    %c0_i32_0 = arith.constant 0 : i32
    %c0_i32_1 = arith.constant 0 : i32
    return %c0_i32, %c0_i32_0 : i32, i32
  }
  func.func @transform_7(%arg0: i32) -> (i32, i32) {
    %c0_i32 = arith.constant 0 : i32
    %c0_i32_0 = arith.constant 0 : i32
    return %arg0, %c0_i32 : i32, i32
  }
}

</mosaic_0001>

<bundles_post_ra>
// kernel: tpu_custom_call.1
= control target key start
LH: loop header
LB: loop body
LE: loop exit
PB: predicated region body
PF: predicated region fallthrough
CT: control target
= control target key end

     0   :  { %12 = vsyncpa [#allocation3], 0  ;;  %s346_s0 = inlined_call_operand.hbm [shape: f32[8,20], index: 0, kind: input, shape index: {}]   ;;  %s347_s1 = inlined_call_operand.hbm [shape: f32[20,64], index: 1, kind: input, shape index: {}]   ;;  %s348_s2 = inlined_call_operand.vmem [shape: f32[1,64], index: 2, kind: input, shape index: {}]   ;;  %s349_s3 = inlined_call_operand.vmem [shape: f32[64,64], index: 3, kind: input, shape index: {}]   ;;  %s350_s4 = inlined_call_operand.vmem [shape: f32[1,64], index: 4, kind: input, shape index: {}]   ;;  %s351_s5 = inlined_call_operand.vmem [shape: f32[64,2], index: 5, kind: input, shape index: {}]   ;;  %s352_s6 = inlined_call_operand.vmem [shape: f32[1,2], index: 6, kind: input, shape index: {}]   ;;  %s353_s7 = inlined_call_operand.vmem [shape: f32[8,2], index: 7, kind: output, shape index: {}]  }
   0x1   :  { %s19_s26 = sshll.u32 %s346_s0, 4  ;;  %s20_s26 = int_to_ptr.hbm [resolvable:$true] %s19_s26 }
   0x2   :  { %13 = vsyncpa [#allocation5], 0  ;;  %s236_s27 = smov [#allocation2]   ;;  %s29_s8 = sshll.u32 %s347_s1, 4  ;;  %s30_s8 = int_to_ptr.hbm [resolvable:$true] %s29_s8 }
   0x3   :  { %s21_s28 = sshll.u32 %s236_s27, 4  ;;  %s237_s9 = smov [#allocation4]   ;;  %s22_s28 = int_to_ptr.vmem [resolvable:$true] %s21_s28 }
   0x4   :  { %24 = dma.hbm_to_vmem [thread:$0]  %s20_s26, 128, %s22_s28, [#allocation3]  }
   0x5   :  { %s31_s10 = sshll.u32 %s237_s9, 4  ;;  %s238_s11 = smov 128   ;;  %s32_s10 = int_to_ptr.vmem [resolvable:$true] %s31_s10 }
   0x6   :  { %s239_s12 = smov 8  }
   0x7   :  { %37 = dma.hbm_to_vmem [thread:$0]  %s30_s8, 384, %s32_s10, [#allocation5], %s238_s11, %s238_s11, %s239_s12  }
   0x8   :  { %232 = dma.done.wait [#allocation3], 128  }
   0x9   :  { %233 = vsyncadd [#allocation3], 4294967168 }
   0xa   :  { %234 = dma.done.wait [#allocation5], 384  }
   0xb   :  { %235 = vsyncadd [#allocation5], 4294966912  ;;  %vm68_vm0 = vcmask 1043456   ;;  %v59_v0 = vld [vmem:[#allocation4 + $0x10] sm:$0xf]  ;;  %v58_v1 = vld [vmem:[#allocation4 + $0x8] sm:$0xff] }
   0xc   :  { %173 = vmatpush.msk.msra.mxu0 %vm68_vm0, %v59_v0  ;;  %v100_v2 = vld [vmem:[%s349_s3 + $0x38] sm:$0xff]  ;;  %v99_v3 = vld [vmem:[%s349_s3 + $0x30] sm:$0xff]  ;;  %v57_v4 = vld [vmem:[#allocation4] sm:$0xff]  ;;  %vm64_vm1 = vcmask 162816   ;;  %vm105_vm2 = vcmask 523264   ;;  %vm165_vm3 = vcmask 15360  }
   0xd   :  { %v56_v5 = vld [vmem:[#allocation2] sm:$0xff]  ;;  %117 = vmatpush.msra.mxu1 %v100_v2  ;;  %v98_v6 = vld [vmem:[%s349_s3 + $0x28] sm:$0xff]  ;;  %v96_v8 = vld [vmem:[%s349_s3 + $0x18] sm:$0xff] }
   0xe   :  { %86 = vmatpush.msra.mxu0 %v58_v1  ;;  %v97_v7 = vld [vmem:[%s349_s3 + $0x20] sm:$0xff]  ;;  %v95_v9 = vld [vmem:[%s349_s3 + $0x10] sm:$0xff]  ;;  %v94_v10 = vld [vmem:[%s349_s3 + $0x8] sm:$0xff] }
   0xf   :  { %118 = vmatpush.msra.mxu1 %v99_v3  ;;  %v93_v11 = vld [vmem:[%s349_s3] sm:$0xff]  ;;  %v137_v12 = vld [vmem:[%s351_s5 + $0x38] sm:$0xff]  ;;  %v136_v13 = vld [vmem:[%s351_s5 + $0x30] sm:$0xff] }
  0x10   :  { %87 = vmatpush.msra.mxu0 %v57_v4  ;;  %153 = vmatpush.msra.mxu2 %v137_v12  ;;  %v135_v14 = vld [vmem:[%s351_s5 + $0x28] sm:$0xff]  ;;  %v134_v15 = vld [vmem:[%s351_s5 + $0x20] sm:$0xff]  ;;  %v133_v16 = vld [vmem:[%s351_s5 + $0x18] sm:$0xff] }
  0x11   :  { %174 = vmatmul.msk.f32.vlgmr.msra.gmra.mxu0 %vm64_vm1, %v56_v5  ;;  %119 = vmatpush.msra.mxu1 %v98_v6  ;;  %v181_v17 = vld [vmem:[%s348_s2] ss:$0 sm:$0xff]  ;;  %v132_v21 = vld [vmem:[%s351_s5 + $0x10] sm:$0xff]  ;;  %v131_v22 = vld [vmem:[%s351_s5 + $0x8] sm:$0xff] }
  0x12   :  { %154 = vmatpush.msra.mxu2 %v136_v13  ;;  %v130_v23 = vld [vmem:[%s351_s5] sm:$0xff] }
  0x13   :  { %120 = vmatpush.msra.mxu1 %v97_v7  ;;  %v182_v24 = vld [vmem:[%s350_s4] ss:$0 sm:$0xff] }
  0x14   :  { %155 = vmatpush.msra.mxu2 %v135_v14  ;;  %v183_v28 = vld [vmem:[%s352_s6] ss:$0 sm:$0xff] }
  0x15   :  { %121 = vmatpush.msra.mxu1 %v96_v8 }
  0x16   :  { %156 = vmatpush.msra.mxu2 %v134_v15 }
  0x17   :  { %122 = vmatpush.msra.mxu1 %v95_v9 }
  0x18   :  { %157 = vmatpush.msra.mxu2 %v133_v16 }
  0x19   :  { %123 = vmatpush.msra.mxu1 %v94_v10 }
  0x1a   :  { %158 = vmatpush.msra.mxu2 %v132_v21 }
  0x1b   :  { %124 = vmatpush.msra.mxu1 %v93_v11 }
  0x1c   :  { %159 = vmatpush.msra.mxu2 %v131_v22 }
  0x1e   :  { %160 = vmatpush.msra.mxu2 %v130_v23 }
  0x8e   :  { %v89_v18 = vpop.f32.mrf.mxu0 }
  0x8f   :  { %v90_v19 = vadd.f32 %v181_v17, %v89_v18 }
  0x91   :  { %v92_v20 = vmax.f32 %v90_v19, 0.0 }
  0x93   :  { %175 = vmatmul.msk.f32.vlgmr.msra.gmra.mxu1 %vm105_vm2, %v92_v20 }
 0x110   :  { %v126_v25 = vpop.f32.mrf.mxu1 }
 0x111   :  { %v127_v26 = vadd.f32 %v182_v24, %v126_v25 }
 0x113   :  { %v129_v27 = vmax.f32 %v127_v26, 0.0 }
 0x115   :  { %176 = vmatmul.msk.f32.vlgmr.msra.gmra.mxu2 %vm105_vm2, %v129_v27 }
 0x198   :  { %v162_v29 = vpop.f32.mrf.mxu2 }
 0x199   :  { %v163_v30 = vadd.f32 %v183_v28, %v162_v29 }
 0x19b   :  { %166 = vst.msk [vmem:[%s353_s7] sm:$0xff] %vm165_vm3, %v163_v30 }
 0x19c   :  { %171 = vsyncpa [#allocation3], 1 }
 0x19d   :  { %172 = vsyncpa [#allocation5], 1 }

</bundles_post_ra>
